<compile_context>
chip_gen: v6e
topology: v6e:2x2x1
jax: 0.10.0
libtpu: 0.0.40
codegen_flags: <defaults>
</compile_context>

<pallas_src>
import functools
from math import sqrt

import jax
import jax.numpy as jnp
from jax.experimental import pallas as pl
from jax.experimental.pallas import tpu as pltpu

LANE = 128
SUBLANE = 8


def _round_up(n, m):
    return ((n + m - 1) // m) * m


# ----------------------------------------------------------------------------
# Kernel: lane-pad input -> (Linear -> PReLU) x num_layers -> output Linear
# ----------------------------------------------------------------------------
def _mlp_kernel(num_layers, in_features,
                x_ref, w_ref, ba_ref, wo_ref, bo_ref, out_ref, xpad_ref):
    cdt = w_ref.dtype  # MXU compute dtype (bf16 by default, f32 optional)

    # Lane-pad the raw (Bt, F) tile to (Bt, P) inside VMEM. Padded lanes are exactly zero,
    # matching the zero-padded weight rows, so real columns are unaffected.
    xpad_ref[...] = jnp.zeros_like(xpad_ref)
    xpad_ref[:, :in_features] = x_ref[...].astype(cdt)
    h = xpad_ref[...]                                        # (Bt, P) compute dtype

    for i in range(num_layers):
        # Linear: MXU matmul with f32 accumulation, then bias (f32).
        acc = jnp.dot(h, w_ref[i], preferred_element_type=jnp.float32)
        ba = ba_ref[i]                                       # (2, P): row 0 bias, row 1 alpha
        acc = acc + ba[0:1, :]
        # PReLU (per-channel slope), elementwise math in f32: x if x >= 0 else alpha * x.
        acc = jnp.where(acc >= 0.0, acc, ba[1:2, :] * acc)
        # Dropout: identity at inference.
        # TODO(synk): training-mode Dropout and the useBatchNorm=True (BatchNorm1d) path
        #             are not implemented (module default is eval / useBatchNorm=False).
        h = acc.astype(cdt)

    # Output head: (Bt, P) @ (P, OUT_P) + bias, lane-dense store.
    out = jnp.dot(h, wo_ref[...], preferred_element_type=jnp.float32) + bo_ref[...]
    out_ref[...] = out.astype(out_ref.dtype)


# ----------------------------------------------------------------------------
# Parameter packing
# ----------------------------------------------------------------------------
def pack_params(params, in_features, compute_dtype=jnp.bfloat16):
    """Pack all layers into lane/sublane-padded slabs.

    Returns a dict with:
      w_stack : (L, P, P)     compute_dtype  hidden weights (already (in, out) oriented)
      ba_stack: (L, 2, P)     f32            row 0 = bias, row 1 = PReLU alpha
      w_out   : (P, OUT_P)    compute_dtype  output head weight (OUT_P = 128)
      b_out   : (1, OUT_P)    f32            output head bias
    """
    hidden = params["layers"]
    L = len(hidden)
    hidden_dims = [W.shape[1] for (W, _, _) in hidden]
    P = _round_up(max(max(hidden_dims), in_features, LANE), LANE)
    out_dim = params["W_out"].shape[1]
    OUT_P = _round_up(max(out_dim, LANE), LANE)

    w_slabs, ba_slabs = [], []
    for (W, b, a) in hidden:
        wp = jnp.zeros((P, P), jnp.float32).at[: W.shape[0], : W.shape[1]].set(W)
        w_slabs.append(wp.astype(compute_dtype))
        ba = jnp.zeros((2, P), jnp.float32)
        ba = ba.at[0, : b.shape[0]].set(b).at[1, : a.shape[0]].set(a)
        ba_slabs.append(ba)

    Wo, bo = params["W_out"], params["b_out"]
    w_out = (jnp.zeros((P, OUT_P), jnp.float32)
             .at[: Wo.shape[0], : Wo.shape[1]].set(Wo).astype(compute_dtype))
    b_out = jnp.zeros((1, OUT_P), jnp.float32).at[0, : bo.shape[0]].set(bo)

    return {
        "w_stack": jnp.stack(w_slabs),
        "ba_stack": jnp.stack(ba_slabs),
        "w_out": w_out,
        "b_out": b_out,
        "P": P,
        "OUT_P": OUT_P,
        "num_layers": L,
        "in_features": in_features,
        "out_dim": out_dim,
    }


def _cost_estimate(batch, in_features, num_layers, P, OUT_P, w_itemsize):
    flops = 2 * batch * (num_layers * P * P + P * OUT_P)
    bytes_accessed = (
        batch * in_features * 4 + batch * OUT_P * 4
        + num_layers * P * P * w_itemsize + num_layers * 2 * P * 4
        + P * OUT_P * w_itemsize + OUT_P * 4)
    return pl.CostEstimate(flops=flops, transcendentals=0,
                           bytes_accessed=bytes_accessed)


# ----------------------------------------------------------------------------
# Wrapper
# ----------------------------------------------------------------------------
def horizon_mlp_forward(x, packed, *, small_batch_threshold=512,
                        max_batch_tile=2048, min_grid_steps=4):
    """x: (B, LinearInputSize) float; packed: dict from pack_params. Returns (B, 2) f32."""
    num_layers = packed["num_layers"]
    in_features = packed["in_features"]
    out_dim = packed["out_dim"]
    P, OUT_P = packed["P"], packed["OUT_P"]
    w_stack, ba_stack = packed["w_stack"], packed["ba_stack"]
    w_out, b_out = packed["w_out"], packed["b_out"]

    assert x.ndim == 2 and x.shape[1] == in_features
    B = x.shape[0]
    x = x.astype(jnp.float32)

    kernel = functools.partial(_mlp_kernel, num_layers, in_features)
    operands = (x, w_stack, ba_stack, w_out, b_out)
    w_itemsize = jnp.dtype(w_stack.dtype).itemsize
    cost = _cost_estimate(B, in_features, num_layers, P, OUT_P, w_itemsize)

    if B <= small_batch_threshold:
        # Single invocation, no grid: whole problem resident in VMEM, no pipeline overhead.
        out = pl.pallas_call(
            kernel,
            out_shape=jax.ShapeDtypeStruct((B, OUT_P), jnp.float32),
            scratch_shapes=[pltpu.VMEM((B, P), w_stack.dtype)],
            cost_estimate=cost,
        )(*operands)
    else:
        # Adaptive batch tile: big enough (~1-2K rows) to amortize per-step pipeline cost,
        # at least `min_grid_steps` steps so the "parallel" batch axis shards across v7x's
        # two TensorCores, and grid = cdiv(B, tile) so padding waste is < one tile
        # (the partial last block is handled by Pallas boundary masking; padded rows are
        # per-row independent and never written back).
        steps = max(min_grid_steps, pl.cdiv(B, max_batch_tile))
        batch_tile = _round_up(pl.cdiv(B, steps), SUBLANE)
        grid_len = pl.cdiv(B, batch_tile)
        out = pl.pallas_call(
            kernel,
            out_shape=jax.ShapeDtypeStruct((B, OUT_P), jnp.float32),
            grid=(grid_len,),
            in_specs=[
                pl.BlockSpec((batch_tile, in_features), lambda i: (i, 0)),
                pl.BlockSpec(w_stack.shape, lambda i: (0, 0, 0)),   # VMEM-resident weights
                pl.BlockSpec(ba_stack.shape, lambda i: (0, 0, 0)),
                pl.BlockSpec(w_out.shape, lambda i: (0, 0)),
                pl.BlockSpec(b_out.shape, lambda i: (0, 0)),
            ],
            out_specs=pl.BlockSpec((batch_tile, OUT_P), lambda i: (i, 0)),
            scratch_shapes=[pltpu.VMEM((batch_tile, P), w_stack.dtype)],
            compiler_params=pltpu.CompilerParams(
                dimension_semantics=("parallel",)),
            cost_estimate=cost,
        )(*operands)

    return out[:, :out_dim]


# ----------------------------------------------------------------------------
# Deterministic parameter construction (mirrors the module's __init__)
# ----------------------------------------------------------------------------
def make_params(key, linear_input_size, out_channel_sizes):
    """Kaiming-uniform weights (leaky_relu gain), zero bias, per-channel PReLU slope 0.25."""
    layers = []
    in_size = linear_input_size
    for out_size in out_channel_sizes:
        key, kw = jax.random.split(key)
        gain = sqrt(2.0)                       # calculate_gain('leaky_relu', a=0)
        bound = gain * sqrt(3.0 / in_size)     # kaiming_uniform bound, fan_in mode
        # PyTorch stores (out, in); transpose to (in, out) so the kernel computes x @ W.
        W_pt = jax.random.uniform(kw, (out_size, in_size), jnp.float32, -bound, bound)
        layers.append((W_pt.T,
                       jnp.zeros((out_size,), jnp.float32),          # init.constant_(bias, 0)
                       jnp.full((out_size,), 0.25, jnp.float32)))    # nn.PReLU(out_size) init
        in_size = out_size

    # DenseOutput: nn.Linear default init (uniform +/- 1/sqrt(fan_in))
    key, kw, kb = jax.random.split(key, 3)
    bound = 1.0 / sqrt(in_size)
    W_out_pt = jax.random.uniform(kw, (2, in_size), jnp.float32, -bound, bound)
    b_out = jax.random.uniform(kb, (2,), jnp.float32, -bound, bound)
    return {"layers": layers, "W_out": W_out_pt.T, "b_out": b_out}


def reference_forward(x, params, matmul_dtype=None):
    """Pure-JAX reference (eval-mode semantics).

    matmul_dtype=None   -> full-f32 reference (precision=HIGHEST).
    matmul_dtype=bf16   -> mirrors the kernel's mixed-precision matmuls (f32 accumulation).
    """
    def mm(a, w):
        if matmul_dtype is None:
            return jnp.dot(a, w, preferred_element_type=jnp.float32,
                           precision=jax.lax.Precision.HIGHEST)
        return jnp.dot(a.astype(matmul_dtype), w.astype(matmul_dtype),
                       preferred_element_type=jnp.float32)

    val = x.astype(jnp.float32)
    for (W, b, alpha) in params["layers"]:
        val = mm(val, W) + b
        val = jnp.where(val >= 0.0, val, alpha[None, :] * val)
    return mm(val, params["W_out"]) + params["b_out"]


if __name__ == "__main__":
    LINEAR_INPUT_SIZE = 58
    OUT_CHANNEL_SIZES = [32, 64, 32]

    key = jax.random.PRNGKey(0)
    kx1, kx2, kp = jax.random.split(key, 3)
    params = make_params(kp, LINEAR_INPUT_SIZE, OUT_CHANNEL_SIZES)
    packed = pack_params(params, LINEAR_INPUT_SIZE)   # bf16 MXU operands (default fast path)

    # --- Small batch -> gridless single-invocation path ---------------------------------
    x_small = jax.random.normal(kx1, (8, LINEAR_INPUT_SIZE), jnp.float32)
    out_small = jax.block_until_ready(horizon_mlp_forward(x_small, packed))
    assert out_small.shape == (8, 2)
    ref_small_mixed = reference_forward(x_small, params, matmul_dtype=jnp.bfloat16)
    ref_small_f32 = reference_forward(x_small, params)
    assert jnp.allclose(out_small, ref_small_mixed, atol=1e-4, rtol=1e-4), \
        "small-batch mismatch vs mixed-precision reference"
    assert jnp.allclose(out_small, ref_small_f32, atol=3e-2, rtol=3e-2), \
        "small-batch mismatch vs f32 reference"

    # --- Larger batch -> batch-tiled grid path (partial last tile exercised) ------------
    x_big = jax.random.normal(kx2, (1603, LINEAR_INPUT_SIZE), jnp.float32)
    out_big = jax.block_until_ready(horizon_mlp_forward(x_big, packed))
    assert out_big.shape == (1603, 2)
    ref_big_mixed = reference_forward(x_big, params, matmul_dtype=jnp.bfloat16)
    ref_big_f32 = reference_forward(x_big, params)
    assert jnp.allclose(out_big, ref_big_mixed, atol=1e-4, rtol=1e-4), \
        "batched mismatch vs mixed-precision reference"
    assert jnp.allclose(out_big, ref_big_f32, atol=3e-2, rtol=3e-2), \
        "batched mismatch vs f32 reference"

    print("KERNEL_OK")
</pallas_src>

<mosaic_0001>
module attributes {stable_mosaic.version = 11 : i64} {
  func.func @_mlp_kernel(%arg0: memref<8x58xf32, #tpu.memory_space<vmem>>, %arg1: memref<3x128x128xbf16, #tpu.memory_space<vmem>>, %arg2: memref<3x2x128xf32, #tpu.memory_space<vmem>>, %arg3: memref<128x128xbf16, #tpu.memory_space<vmem>>, %arg4: memref<1x128xf32, #tpu.memory_space<vmem>>, %arg5: memref<8x128xf32, #tpu.memory_space<vmem>>, %arg6: memref<8x128xbf16, #tpu.memory_space<vmem>>) attributes {dimension_semantics = [], scalar_prefetch = 0 : i64, scratch_operands = 1 : i64, tpu.core_type = #tpu.core_type<tc>} {
    %cst = arith.constant 0.000000e+00 : bf16
    %0 = vector.broadcast %cst : bf16 to vector<8x128xbf16>
    %c0 = arith.constant 0 : index
    %c0_0 = arith.constant 0 : index
    %1 = vector.load %arg6[%c0, %c0_0] : memref<8x128xbf16, #tpu.memory_space<vmem>>, vector<8x128xbf16>
    tpu.vector_store %arg6[%c0, %c0_0], %0 {strides = array<i32>} : memref<8x128xbf16, #tpu.memory_space<vmem>>, vector<8x128xbf16>,
    %c0_1 = arith.constant 0 : index
    %c0_2 = arith.constant 0 : index
    %2 = vector.load %arg0[%c0_1, %c0_2] : memref<8x58xf32, #tpu.memory_space<vmem>>, vector<8x58xf32>
    %3 = arith.truncf %2 : vector<8x58xf32> to vector<8x58xbf16>
    %c0_3 = arith.constant 0 : index
    %c0_4 = arith.constant 0 : index
    %4 = vector.load %arg6[%c0_3, %c0_4] : memref<8x128xbf16, #tpu.memory_space<vmem>>, vector<8x58xbf16>
    tpu.vector_store %arg6[%c0_3, %c0_4], %3 {strides = array<i32>} : memref<8x128xbf16, #tpu.memory_space<vmem>>, vector<8x58xbf16>,
    %c0_5 = arith.constant 0 : index
    %c0_6 = arith.constant 0 : index
    %5 = vector.load %arg6[%c0_5, %c0_6] : memref<8x128xbf16, #tpu.memory_space<vmem>>, vector<8x128xbf16>
    %c0_7 = arith.constant 0 : index
    %c0_8 = arith.constant 0 : index
    %c0_9 = arith.constant 0 : index
    %6 = vector.load %arg1[%c0_7, %c0_8, %c0_9] : memref<3x128x128xbf16, #tpu.memory_space<vmem>>, vector<1x128x128xbf16>
    %7 = vector.shape_cast %6 : vector<1x128x128xbf16> to vector<128x128xbf16>
    %cst_10 = arith.constant dense<0.000000e+00> : vector<8x128xf32>
    %8 = tpu.matmul %5, %7, %cst_10 {dimension_numbers = #tpu.dot_dimension_numbers<[1], [0], [0], [1], [0, 0, 1, 1], [], []>} : vector<8x128xbf16>, vector<128x128xbf16>, vector<8x128xf32> -> vector<8x128xf32>
    %c0_11 = arith.constant 0 : index
    %c0_12 = arith.constant 0 : index
    %c0_13 = arith.constant 0 : index
    %9 = vector.load %arg2[%c0_11, %c0_12, %c0_13] : memref<3x2x128xf32, #tpu.memory_space<vmem>>, vector<1x2x128xf32>
    %10 = vector.shape_cast %9 : vector<1x2x128xf32> to vector<2x128xf32>
    %11 = vector.extract_strided_slice %10 {offsets = [0, 0], sizes = [1, 128], strides = [1, 1]} : vector<2x128xf32> to vector<1x128xf32>
    %12 = vector.broadcast %11 : vector<1x128xf32> to vector<8x128xf32>
    %13 = arith.addf %8, %12 : vector<8x128xf32>
    %cst_14 = arith.constant 0.000000e+00 : f32
    %14 = vector.broadcast %cst_14 : f32 to vector<8x128xf32>
    %15 = arith.cmpf oge, %13, %14 : vector<8x128xf32>
    %16 = vector.extract_strided_slice %10 {offsets = [1, 0], sizes = [1, 128], strides = [1, 1]} : vector<2x128xf32> to vector<1x128xf32>
    %17 = vector.broadcast %16 : vector<1x128xf32> to vector<8x128xf32>
    %18 = arith.mulf %17, %13 : vector<8x128xf32>
    %19 = arith.select %15, %13, %18 : vector<8x128xi1>, vector<8x128xf32>
    %20 = arith.truncf %19 : vector<8x128xf32> to vector<8x128xbf16>
    %c1 = arith.constant 1 : index
    %c0_15 = arith.constant 0 : index
    %c0_16 = arith.constant 0 : index
    %21 = vector.load %arg1[%c1, %c0_15, %c0_16] : memref<3x128x128xbf16, #tpu.memory_space<vmem>>, vector<1x128x128xbf16>
    %22 = vector.shape_cast %21 : vector<1x128x128xbf16> to vector<128x128xbf16>
    %cst_17 = arith.constant dense<0.000000e+00> : vector<8x128xf32>
    %23 = tpu.matmul %20, %22, %cst_17 {dimension_numbers = #tpu.dot_dimension_numbers<[1], [0], [0], [1], [0, 0, 1, 1], [], []>} : vector<8x128xbf16>, vector<128x128xbf16>, vector<8x128xf32> -> vector<8x128xf32>
    %c1_18 = arith.constant 1 : index
    %c0_19 = arith.constant 0 : index
    %c0_20 = arith.constant 0 : index
    %24 = vector.load %arg2[%c1_18, %c0_19, %c0_20] : memref<3x2x128xf32, #tpu.memory_space<vmem>>, vector<1x2x128xf32>
    %25 = vector.shape_cast %24 : vector<1x2x128xf32> to vector<2x128xf32>
    %26 = vector.extract_strided_slice %25 {offsets = [0, 0], sizes = [1, 128], strides = [1, 1]} : vector<2x128xf32> to vector<1x128xf32>
    %27 = vector.broadcast %26 : vector<1x128xf32> to vector<8x128xf32>
    %28 = arith.addf %23, %27 : vector<8x128xf32>
    %cst_21 = arith.constant 0.000000e+00 : f32
    %29 = vector.broadcast %cst_21 : f32 to vector<8x128xf32>
    %30 = arith.cmpf oge, %28, %29 : vector<8x128xf32>
    %31 = vector.extract_strided_slice %25 {offsets = [1, 0], sizes = [1, 128], strides = [1, 1]} : vector<2x128xf32> to vector<1x128xf32>
    %32 = vector.broadcast %31 : vector<1x128xf32> to vector<8x128xf32>
    %33 = arith.mulf %32, %28 : vector<8x128xf32>
    %34 = arith.select %30, %28, %33 : vector<8x128xi1>, vector<8x128xf32>
    %35 = arith.truncf %34 : vector<8x128xf32> to vector<8x128xbf16>
    %c2 = arith.constant 2 : index
    %c0_22 = arith.constant 0 : index
    %c0_23 = arith.constant 0 : index
    %36 = vector.load %arg1[%c2, %c0_22, %c0_23] : memref<3x128x128xbf16, #tpu.memory_space<vmem>>, vector<1x128x128xbf16>
    %37 = vector.shape_cast %36 : vector<1x128x128xbf16> to vector<128x128xbf16>
    %cst_24 = arith.constant dense<0.000000e+00> : vector<8x128xf32>
    %38 = tpu.matmul %35, %37, %cst_24 {dimension_numbers = #tpu.dot_dimension_numbers<[1], [0], [0], [1], [0, 0, 1, 1], [], []>} : vector<8x128xbf16>, vector<128x128xbf16>, vector<8x128xf32> -> vector<8x128xf32>
    %c2_25 = arith.constant 2 : index
    %c0_26 = arith.constant 0 : index
    %c0_27 = arith.constant 0 : index
    %39 = vector.load %arg2[%c2_25, %c0_26, %c0_27] : memref<3x2x128xf32, #tpu.memory_space<vmem>>, vector<1x2x128xf32>
    %40 = vector.shape_cast %39 : vector<1x2x128xf32> to vector<2x128xf32>
    %41 = vector.extract_strided_slice %40 {offsets = [0, 0], sizes = [1, 128], strides = [1, 1]} : vector<2x128xf32> to vector<1x128xf32>
    %42 = vector.broadcast %41 : vector<1x128xf32> to vector<8x128xf32>
    %43 = arith.addf %38, %42 : vector<8x128xf32>
    %cst_28 = arith.constant 0.000000e+00 : f32
    %44 = vector.broadcast %cst_28 : f32 to vector<8x128xf32>
    %45 = arith.cmpf oge, %43, %44 : vector<8x128xf32>
    %46 = vector.extract_strided_slice %40 {offsets = [1, 0], sizes = [1, 128], strides = [1, 1]} : vector<2x128xf32> to vector<1x128xf32>
    %47 = vector.broadcast %46 : vector<1x128xf32> to vector<8x128xf32>
    %48 = arith.mulf %47, %43 : vector<8x128xf32>
    %49 = arith.select %45, %43, %48 : vector<8x128xi1>, vector<8x128xf32>
    %50 = arith.truncf %49 : vector<8x128xf32> to vector<8x128xbf16>
    %c0_29 = arith.constant 0 : index
    %c0_30 = arith.constant 0 : index
    %51 = vector.load %arg3[%c0_29, %c0_30] : memref<128x128xbf16, #tpu.memory_space<vmem>>, vector<128x128xbf16>
    %cst_31 = arith.constant dense<0.000000e+00> : vector<8x128xf32>
    %52 = tpu.matmul %50, %51, %cst_31 {dimension_numbers = #tpu.dot_dimension_numbers<[1], [0], [0], [1], [0, 0, 1, 1], [], []>} : vector<8x128xbf16>, vector<128x128xbf16>, vector<8x128xf32> -> vector<8x128xf32>
    %c0_32 = arith.constant 0 : index
    %c0_33 = arith.constant 0 : index
    %53 = vector.load %arg4[%c0_32, %c0_33] : memref<1x128xf32, #tpu.memory_space<vmem>>, vector<1x128xf32>
    %54 = vector.broadcast %53 : vector<1x128xf32> to vector<8x128xf32>
    %55 = arith.addf %52, %54 : vector<8x128xf32>
    %c0_34 = arith.constant 0 : index
    %c0_35 = arith.constant 0 : index
    %56 = vector.load %arg5[%c0_34, %c0_35] : memref<8x128xf32, #tpu.memory_space<vmem>>, vector<8x128xf32>
    tpu.vector_store %arg5[%c0_34, %c0_35], %55 {strides = array<i32>} : memref<8x128xf32, #tpu.memory_space<vmem>>, vector<8x128xf32>,
    return
  }
}

</mosaic_0001>

<bundles_post_ra>
// kernel: tpu_custom_call.1
= control target key start
LH: loop header
LB: loop body
LE: loop exit
PB: predicated region body
PF: predicated region fallthrough
CT: control target
= control target key end

     0   :  { %10 = vsyncpa [#allocation4], 0  ;;  %s977_s0 = inlined_call_operand.hbm [shape: f32[8,58], index: 0, kind: input, shape index: {}]   ;;  %s978_s1 = inlined_call_operand.hbm [shape: bf16[3,128,128], index: 1, kind: input, shape index: {}]   ;;  %s979_s2 = inlined_call_operand.hbm [shape: f32[3,2,128], index: 2, kind: input, shape index: {}]   ;;  %s980_s3 = inlined_call_operand.hbm [shape: bf16[128,128], index: 3, kind: input, shape index: {}]   ;;  %s981_s4 = inlined_call_operand.vmem [shape: f32[1,128], index: 4, kind: input, shape index: {}]   ;;  %s982_s5 = inlined_call_operand.hbm [shape: f32[8,128], index: 5, kind: output, shape index: {}]  }
   0x1   :  { %11 = vsyncpa [#allocation7], 0 }
   0x2   :  { %12 = vsyncpa [#allocation10], 0 }
   0x3   :  { %13 = vsyncpa [#allocation5], 0  ;;  %s866_s18 = smov [#allocation6]  }
   0x4   :  { %s29_s19 = sshll.u32 %s866_s18, 4  ;;  %s30_s19 = int_to_ptr.vmem [resolvable:$true] %s29_s19 }
   0x5   :  { %s766_s20 = scalar_lea.vmem %s30_s19, 3072  ;;  %p771_p1 = scmp.lt.s32.totalorder %s30_s19, %s30_s19 }
   0x6   :  { %p767_p0 = scmp.ne.s32.totalorder %s30_s19, %s766_s20  ;;  %p772_p2 = scmp.lt.s32.totalorder %s766_s20, %s766_s20 }
   0x8   :  { %p773_p3 = por %p772_p2, %p771_p1 }
   0xa   :  { %p774_p4 = pnand %p773_p3, %p767_p0 }
   0xc   :  { %777 = shalt.err (!%p774_p4)
}
   0xd   :  { %s867_s21 = smov 64   ;;  %s868_s22 = smov 4  }
   0xe   :  { %35 = dma.hbm_to_vmem [thread:$0]  %s978_s1, 3072, %s30_s19, [#allocation7], %s867_s21, %s867_s21, %s868_s22  }
   0xf   :  { %s869_s25 = smov [#allocation3]   ;;  %s870_s27 = smov [#allocation8]  }
  0x10   :  { %s20_s26 = sshll.u32 %s869_s25, 4  ;;  %s41_s28 = sshll.u32 %s870_s27, 4  ;;  %s21_s26 = int_to_ptr.vmem [resolvable:$true] %s20_s26  ;;  %s42_s28 = int_to_ptr.vmem [resolvable:$true] %s41_s28 }
  0x11   :  { %s786_s29 = scalar_lea.vmem %s21_s26, 128  ;;  %p791_p6 = scmp.lt.s32.totalorder %s21_s26, %s21_s26 }
  0x12   :  { %p787_p5 = scmp.ne.s32.totalorder %s21_s26, %s786_s29  ;;  %p792_p7 = scmp.lt.s32.totalorder %s786_s29, %s786_s29 }
  0x14   :  { %p793_p8 = por %p792_p7, %p791_p6 }
  0x16   :  { %p794_p9 = pnand %p793_p8, %p787_p5 }
  0x18   :  { %797 = shalt.err (!%p794_p9)
}
  0x19   :  { %23 = dma.hbm_to_vmem [thread:$0]  %s977_s0, 128, %s21_s26, [#allocation4]  }
  0x1a   :  { %s806_s7 = scalar_lea.vmem %s42_s28, 96  ;;  %p811_p11 = scmp.lt.s32.totalorder %s42_s28, %s42_s28 }
  0x1b   :  { %p807_p10 = scmp.ne.s32.totalorder %s42_s28, %s806_s7  ;;  %p812_p12 = scmp.lt.s32.totalorder %s806_s7, %s806_s7 }
  0x1d   :  { %p813_p13 = por %p812_p12, %p811_p11 }
  0x1f   :  { %p814_p0 = pnand %p813_p13, %p807_p10 }
  0x21   :  { %817 = shalt.err (!%p814_p0)
}
  0x22   :  { %s871_s1 = smov 32   ;;  %s872_s8 = smov 2  }
  0x23   :  { %47 = dma.hbm_to_vmem [thread:$0]  %s979_s2, 96, %s42_s28, [#allocation7], %s871_s1, %s871_s1, %s872_s8  }
  0x24   :  { %s873_s11 = smov [#allocation9]  }
  0x25   :  { %s53_s12 = sshll.u32 %s873_s11, 4  ;;  %s54_s12 = int_to_ptr.vmem [resolvable:$true] %s53_s12 }
  0x26   :  { %s826_s13 = scalar_lea.vmem %s54_s12, 1024  ;;  %p831_p2 = scmp.lt.s32.totalorder %s54_s12, %s54_s12 }
  0x27   :  { %p827_p1 = scmp.ne.s32.totalorder %s54_s12, %s826_s13  ;;  %p832_p3 = scmp.lt.s32.totalorder %s826_s13, %s826_s13 }
  0x29   :  { %p833_p4 = por %p832_p3, %p831_p2 }
  0x2b   :  { %p834_p5 = pnand %p833_p4, %p827_p1 }
  0x2d   :  { %837 = shalt.err (!%p834_p5)
}
  0x2e   :  { %59 = dma.hbm_to_vmem [thread:$0]  %s980_s3, 1024, %s54_s12, [#allocation10], %s867_s21, %s867_s21, %s868_s22  }
  0x2f   :  { %858 = dma.done.wait [#allocation4], 128  }
  0x30   :  { %859 = vsyncadd [#allocation4], 4294967168 }
  0x31   :  { %860 = dma.done.wait [#allocation7], 3168  }
  0x32   :  { %861 = vsyncadd [#allocation7], 4294964128 }
  0x33   :  { %862 = dma.done.wait [#allocation10], 1024  }
  0x34   :  { %863 = vsyncadd [#allocation10], 4294966272  ;;  %v874_v0 = vmov 0.0   ;;  %vm875_vm0 = vmmov 0   ;;  %v876_v1 = vmov 0   ;;  %v726_v2 = vld [vmem:[#allocation6 + $0x38] sm:$0xff]   ;;  %v98_v27 = vlaneseq }
  0x35   :  { %634 = vmatprep.subr.bf16.mxu0 %v874_v0  ;;  %650 = vmatprep.mubr.msk.bf16.mxu0 %vm875_vm0, %v874_v0  ;;  %75 = vst [vmem:[#allocation2] sm:$0xf] %v876_v1  ;;  %v727_v3 = vld [vmem:[#allocation6 + $0x30] sm:$0xff]   ;;  %v728_v4 = vld [vmem:[#allocation6 + $0x28] sm:$0xff]   ;;  %v76_v5 = vld [vmem:[#allocation3] sm:$0xff]  ;;  %vm78_vm1 = vcmask 470016  }
  0x36   :  { %654 = vmatprep.subr.bf16.mxu1 %v874_v0  ;;  %670 = vmatprep.mubr.msk.bf16.mxu1 %vm875_vm0, %v874_v0  ;;  %v77_v6 = vpack.c.bf16 %v76_v5, %v76_v5  ;;  %v734_v7 = vld [vmem:[#allocation6 + $0x78] sm:$0xff]   ;;  %v729_v8 = vld [vmem:[#allocation6 + $0x20] sm:$0xff]   ;;  %v735_v9 = vld [vmem:[#allocation6 + $0x70] sm:$0xff]   ;;  %v99_v28 = vshrl.u32 %v98_v27, 7  ;;  %s877_s15 = smov [#allocation11]  }
  0x37   :  { %635 = vmatpush3.bf16.msra.mxu0 %v726_v2  ;;  %655 = vmatpush3.bf16.msra.mxu1 %v734_v7  ;;  %v730_v10 = vld [vmem:[#allocation6 + $0x18] sm:$0xff]   ;;  %v736_v11 = vld [vmem:[#allocation6 + $0x68] sm:$0xff]   ;;  %v731_v12 = vld [vmem:[#allocation6 + $0x10] sm:$0xff]   ;;  %s554_s16 = sshll.u32 %s877_s15, 4  ;;  %s555_s16 = int_to_ptr.vmem [resolvable:$true] %s554_s16 }
  0x38   :  { %636 = vmatprep.subr.bf16.mxu0 %v874_v0  ;;  %79 = vst.msk [vmem:[#allocation2] sm:$0xf] %vm78_vm1, %v77_v6  ;;  %656 = vmatprep.subr.bf16.mxu1 %v874_v0  ;;  %v737_v13 = vld [vmem:[#allocation6 + $0x60] sm:$0xff]   ;;  %v732_v14 = vld [vmem:[#allocation6 + $0x8] sm:$0xff]   ;;  %v738_v15 = vld [vmem:[#allocation6 + $0x58] sm:$0xff]   ;;  %v100_v29 = vsub.s32 0, %v99_v28  ;;  %p843_p7 = scmp.lt.s32.totalorder %s555_s16, %s555_s16 }
  0x39   :  { %v733_v16 = vld [vmem:[#allocation6] sm:$0xff]   ;;  %v739_v17 = vld [vmem:[#allocation6 + $0x50] sm:$0xff]   ;;  %v740_v19 = vld [vmem:[#allocation6 + $0x48] sm:$0xff]   ;;  %v956_v31 = vsub.s32 1, %v99_v28  ;;  %s838_s17 = scalar_lea.vmem %s555_s16, 128 }
  0x3a   :  { %v741_v20 = vld [vmem:[#allocation6 + $0x40] sm:$0xff]   ;;  %v742_v21 = vld [vmem:[#allocation6 + $0xb8] sm:$0xff]   ;;  %v743_v22 = vld [vmem:[#allocation6 + $0xb0] sm:$0xff]   ;;  %p839_p6 = scmp.ne.s32.totalorder %s555_s16, %s838_s17  ;;  %p844_p8 = scmp.lt.s32.totalorder %s838_s17, %s838_s17 }
  0x3b   :  { %637 = vmatpush3.bf16.msra.mxu0 %v727_v3  ;;  %657 = vmatpush3.bf16.msra.mxu1 %v735_v9  ;;  %v744_v23 = vld [vmem:[#allocation6 + $0xa8] sm:$0xff]   ;;  %v745_v24 = vld [vmem:[#allocation6 + $0xa0] sm:$0xff]   ;;  %v746_v25 = vld [vmem:[#allocation6 + $0x98] sm:$0xff]  }
  0x3c   :  { %638 = vmatprep.subr.bf16.mxu0 %v874_v0  ;;  %658 = vmatprep.subr.bf16.mxu1 %v874_v0  ;;  %v747_v26 = vld [vmem:[#allocation6 + $0x90] sm:$0xff]   ;;  %v97_v30 = vld [vmem:[#allocation8] sm:$0x3]  ;;  %v748_v42 = vld [vmem:[#allocation6 + $0x88] sm:$0xff]   ;;  %p845_p9 = por %p844_p8, %p843_p7 }
  0x3d   :  { %v101_v32 = vrot.slane %v97_v30, %v100_v29  ;;  %v194_v33 = vrot.slane %v97_v30, %v956_v31  ;;  %v749_v43 = vld [vmem:[#allocation6 + $0x80] sm:$0xff]   ;;  %v751_v45 = vld [vmem:[#allocation9 + $0x30] sm:$0xff]   ;;  %v752_v46 = vld [vmem:[#allocation9 + $0x28] sm:$0xff]  }
  0x3e   :  { %v750_v44 = vld [vmem:[#allocation9 + $0x38] sm:$0xff]   ;;  %v753_v47 = vld [vmem:[#allocation9 + $0x20] sm:$0xff]   ;;  %v755_v49 = vld [vmem:[#allocation9 + $0x10] sm:$0xff]   ;;  %p846_p10 = pnand %p845_p9, %p839_p6 }
  0x3f   :  { %639 = vmatpush3.bf16.msra.mxu0 %v728_v4  ;;  %659 = vmatpush3.bf16.msra.mxu1 %v736_v11  ;;  %v80_v18 = vld [vmem:[#allocation2] sm:$0xf]  ;;  %v754_v48 = vld [vmem:[#allocation9 + $0x18] sm:$0xff]   ;;  %v757_v62 = vld [vmem:[#allocation9] sm:$0xff]  }
  0x40   :  { %640 = vmatprep.subr.bf16.mxu0 %v874_v0  ;;  %660 = vmatprep.subr.bf16.mxu1 %v874_v0  ;;  %v216_v50 = vld [vmem:[#allocation8 + $0x2] sm:$0x3]  ;;  %v756_v61 = vld [vmem:[#allocation9 + $0x8] sm:$0xff]   ;;  %v335_v63 = vld [vmem:[#allocation8 + $0x4] sm:$0x3] }
  0x41   :  { %v220_v51 = vrot.slane %v216_v50, %v100_v29  ;;  %v313_v52 = vrot.slane %v216_v50, %v956_v31  ;;  %v339_v1 = vrot.slane %v335_v63, %v100_v29  ;;  %v432_v2 = vrot.slane %v335_v63, %v956_v31 }
  0x43   :  { %641 = vmatpush3.bf16.msra.mxu0 %v729_v8  ;;  %661 = vmatpush3.bf16.msra.mxu1 %v737_v13 }
  0x44   :  { %642 = vmatprep.subr.bf16.mxu0 %v874_v0  ;;  %662 = vmatprep.subr.bf16.mxu1 %v874_v0 }
  0x47   :  { %643 = vmatpush3.bf16.msra.mxu0 %v730_v10  ;;  %663 = vmatpush3.bf16.msra.mxu1 %v738_v15 }
  0x48   :  { %644 = vmatprep.subr.bf16.mxu0 %v874_v0  ;;  %664 = vmatprep.subr.bf16.mxu1 %v874_v0 }
  0x4b   :  { %645 = vmatpush3.bf16.msra.mxu0 %v731_v12  ;;  %665 = vmatpush3.bf16.msra.mxu1 %v739_v17 }
  0x4c   :  { %646 = vmatprep.subr.bf16.mxu0 %v874_v0  ;;  %666 = vmatprep.subr.bf16.mxu1 %v874_v0 }
  0x4f   :  { %647 = vmatpush3.bf16.msra.mxu0 %v732_v14  ;;  %667 = vmatpush3.bf16.msra.mxu1 %v740_v19 }
  0x50   :  { %648 = vmatprep.subr.bf16.mxu0 %v874_v0  ;;  %668 = vmatprep.subr.bf16.mxu1 %v874_v0 }
  0x53   :  { %649 = vmatpush3.bf16.msra.mxu0 %v733_v16  ;;  %669 = vmatpush3.bf16.msra.mxu1 %v741_v20 }
  0x54   :  { %674 = vmatprep.subr.bf16.mxu0 %v874_v0  ;;  %694 = vmatprep.subr.bf16.mxu1 %v874_v0 }
  0x56   :  { %651 = vmatmul.mubr.bf16.vlgmr.msra.gmra.mxu0 %v80_v18 }
  0x57   :  { %690 = vmatprep.mubr.msk.bf16.mxu0 %vm875_vm0, %v874_v0  ;;  %675 = vmatpush3.bf16.msra.mxu0 %v742_v21 }
  0x58   :  { %676 = vmatprep.subr.bf16.mxu0 %v874_v0 }
  0x5b   :  { %677 = vmatpush3.bf16.msra.mxu0 %v743_v22 }
  0x5c   :  { %678 = vmatprep.subr.bf16.mxu0 %v874_v0 }
  0x5f   :  { %679 = vmatpush3.bf16.msra.mxu0 %v744_v23 }
  0x60   :  { %680 = vmatprep.subr.bf16.mxu0 %v874_v0 }
  0x63   :  { %681 = vmatpush3.bf16.msra.mxu0 %v745_v24 }
  0x64   :  { %682 = vmatprep.subr.bf16.mxu0 %v874_v0 }
  0x67   :  { %683 = vmatpush3.bf16.msra.mxu0 %v746_v25 }
  0x68   :  { %684 = vmatprep.subr.bf16.mxu0 %v874_v0 }
  0x6b   :  { %685 = vmatpush3.bf16.msra.mxu0 %v747_v26 }
  0x6c   :  { %686 = vmatprep.subr.bf16.mxu0 %v874_v0 }
  0x6f   :  { %687 = vmatpush3.bf16.msra.mxu0 %v748_v42 }
  0x70   :  { %688 = vmatprep.subr.bf16.mxu0 %v874_v0 }
  0x73   :  { %689 = vmatpush3.bf16.msra.mxu0 %v749_v43 }
 0x116   :  { %v184_v34 = vpop.f32.mrf.mxu0 }
 0x117   :  { %v185_v35 = vadd.f32 %v184_v34, %v101_v32 }
 0x118   :  { %v652_v36 = vpop.f32.mrf.mxu0 }
 0x119   :  { %vm190_vm2 = vcmp.ge.f32.partialorder %v185_v35, 0.0  ;;  %v195_v37 = vmul.f32 %v194_v33, %v185_v35 }
 0x11a   :  { %v187_v38 = vpop.f32.mrf.mxu0 }
 0x11b   :  { %v196_v39 = vsel %vm190_vm2, %v185_v35, %v195_v37 }
 0x11c   :  { %v653_v40 = vpop.f32.mrf.mxu0  ;;  %v197_v41 = vpack.c.bf16 %v196_v39, %v196_v39 }
 0x11e   :  { %671 = vmatmul.mubr.bf16.vlgmr.msra.gmra.mxu1 %v197_v41 }
 0x11f   :  { %710 = vmatprep.mubr.msk.bf16.mxu1 %vm875_vm0, %v874_v0  ;;  %695 = vmatpush3.bf16.msra.mxu1 %v750_v44 }
 0x120   :  { %696 = vmatprep.subr.bf16.mxu1 %v874_v0 }
 0x123   :  { %697 = vmatpush3.bf16.msra.mxu1 %v751_v45 }
 0x124   :  { %698 = vmatprep.subr.bf16.mxu1 %v874_v0 }
 0x127   :  { %699 = vmatpush3.bf16.msra.mxu1 %v752_v46 }
 0x128   :  { %700 = vmatprep.subr.bf16.mxu1 %v874_v0 }
 0x12b   :  { %701 = vmatpush3.bf16.msra.mxu1 %v753_v47 }
 0x12c   :  { %702 = vmatprep.subr.bf16.mxu1 %v874_v0 }
 0x12f   :  { %703 = vmatpush3.bf16.msra.mxu1 %v754_v48 }
 0x130   :  { %704 = vmatprep.subr.bf16.mxu1 %v874_v0 }
 0x133   :  { %705 = vmatpush3.bf16.msra.mxu1 %v755_v49 }
 0x134   :  { %706 = vmatprep.subr.bf16.mxu1 %v874_v0 }
 0x137   :  { %707 = vmatpush3.bf16.msra.mxu1 %v756_v61 }
 0x138   :  { %708 = vmatprep.subr.bf16.mxu1 %v874_v0  ;;  %v589_v0 = vld [vmem:[%s981_s4] ss:$0 sm:$0xff] }
 0x13b   :  { %709 = vmatpush3.bf16.msra.mxu1 %v757_v62 }
 0x1de   :  { %v303_v53 = vpop.f32.mrf.mxu1 }
 0x1df   :  { %v304_v54 = vadd.f32 %v303_v53, %v220_v51 }
 0x1e0   :  { %v672_v55 = vpop.f32.mrf.mxu1 }
 0x1e1   :  { %vm309_vm3 = vcmp.ge.f32.partialorder %v304_v54, 0.0  ;;  %v314_v56 = vmul.f32 %v313_v52, %v304_v54 }
 0x1e2   :  { %v306_v57 = vpop.f32.mrf.mxu1 }
 0x1e3   :  { %v315_v58 = vsel %vm309_vm3, %v304_v54, %v314_v56 }
 0x1e4   :  { %v316_v59 = vpack.c.bf16 %v315_v58, %v315_v58  ;;  %v673_v60 = vpop.f32.mrf.mxu1 }
 0x1e6   :  { %691 = vmatmul.mubr.bf16.vlgmr.msra.gmra.mxu0 %v316_v59 }
 0x2a6   :  { %v422_v3 = vpop.f32.mrf.mxu0 }
 0x2a7   :  { %v423_v4 = vadd.f32 %v422_v3, %v339_v1 }
 0x2a8   :  { %v692_v5 = vpop.f32.mrf.mxu0 }
 0x2a9   :  { %vm428_vm4 = vcmp.ge.f32.partialorder %v423_v4, 0.0  ;;  %v433_v6 = vmul.f32 %v432_v2, %v423_v4 }
 0x2aa   :  { %v425_v7 = vpop.f32.mrf.mxu0 }
 0x2ab   :  { %v434_v8 = vsel %vm428_vm4, %v423_v4, %v433_v6 }
 0x2ac   :  { %v435_v9 = vpack.c.bf16 %v434_v8, %v434_v8  ;;  %v693_v10 = vpop.f32.mrf.mxu0 }
 0x2ae   :  { %711 = vmatmul.mubr.bf16.vlgmr.msra.gmra.mxu1 %v435_v9 }
 0x36e   :  { %v541_v11 = vpop.f32.mrf.mxu1 }
 0x36f   :  { %v542_v12 = vadd.f32 %v589_v0, %v541_v11 }
 0x370   :  { %v712_v13 = vpop.f32.mrf.mxu1 }
 0x371   :  { %547 = vst [vmem:[#allocation11] sm:$0xff] %v542_v12 }
 0x372   :  { %v544_v14 = vpop.f32.mrf.mxu1 }
 0x373   :  { %849 = shalt.err (!%p846_p10)
}
 0x374   :  { %557 = dma.vmem_to_hbm [thread:$0]  %s555_s16, 128, %s982_s5, [#allocation5]   ;;  %v713_v15 = vpop.f32.mrf.mxu1 }
 0x375   :  { %864 = dma.done.wait [#allocation5], 128  }
 0x376   :  { %865 = vsyncadd [#allocation5], 4294967168 }
 0x377   :  { %561 = vsyncpa [#allocation4], 1 }
 0x378   :  { %562 = vsyncpa [#allocation7], 1 }
 0x379   :  { %563 = vsyncpa [#allocation10], 1 }
 0x37a   :  { %564 = vsyncpa [#allocation5], 1 }

</bundles_post_ra>
